<compile_context>
chip_gen: v5e
topology: v5e:2x2
jax: 0.10.0
libtpu: 0.0.40
codegen_flags: <defaults>
</compile_context>

<pallas_src>
import jax
import jax.numpy as jnp
from jax.experimental import pallas as pl
from jax.experimental.pallas import tpu as pltpu


def _chomp_copy_kernel(x_ref, o_ref):
    # Pure copy of the kept columns.  In the lane-blocked (2D-grid) case the
    # block widths match and the slice is a no-op; in the small-W case it
    # drops the trailing chomp columns of the full-width tile.
    o_ref[...] = x_ref[:, : o_ref.shape[-1]]


def _vmem_capacity_bytes() -> int:
    try:
        return int(pltpu.get_tpu_info().vmem_capacity_bytes)
    except Exception:
        return 64 * 1024 * 1024  # conservative fallback (v7x physical VMEM)


def _pick_tiles(R, W, W_out, dtype_bytes):
    vmem_cap = _vmem_capacity_bytes()
    vmem_limit = (vmem_cap * 3) // 4           # 96 MiB on v5e/v6e, 48 MiB on v7x
    buf_budget = vmem_limit // 2               # bytes for the pipeline buffers

    # Sublane packing for the row (second-to-last) axis:
    # 8 (f32), 16 (bf16), 32 (int8/fp8).
    sub = max(8, 32 // dtype_bytes)

    if W_out >= 128:
        # Lane-dense path: 128-multiple blocks along W; bulk stores unmasked,
        # chomped columns only touched in the final ragged lane block.
        tile_w = min(512, (W_out // 128) * 128)
        in_w, out_w = tile_w, tile_w
    else:
        # Small-W path: full-width tiles; lane occupancy is bounded by W
        # itself, so just fold many rows per vreg via a big row tile.
        tile_w = None
        in_w, out_w = W, W_out

    # Double-buffered input + output tiles must fit the budget:
    #   2 * tile_r * (in_w + out_w) * dtype_bytes <= buf_budget
    per_row = 2 * (in_w + out_w) * dtype_bytes
    tile_r = max(sub, buf_budget // per_row)
    tile_r = min((tile_r // sub) * sub, 4096)
    if tile_r >= R:
        tile_r = R                              # single full-height block
    return tile_r, tile_w, vmem_limit


def chomp2d(x: jax.Array, chomp_size: int) -> jax.Array:
    """Equivalent of Chomp2d.forward: x[:, :, :, :-chomp_size].contiguous()."""
    N, C, H, W = x.shape
    assert 0 < chomp_size < W, "chomp_size must be in (0, W)"
    W_out = W - chomp_size
    R = N * C * H

    dtype_bytes = jnp.dtype(x.dtype).itemsize
    tile_r, tile_w, vmem_limit = _pick_tiles(R, W, W_out, dtype_bytes)

    x2 = x.reshape(R, W)  # contiguous row-major view; free in XLA

    if tile_w is None:
        grid = (pl.cdiv(R, tile_r),)
        in_specs = [pl.BlockSpec((tile_r, W), lambda r: (r, 0))]
        out_specs = pl.BlockSpec((tile_r, W_out), lambda r: (r, 0))
        dim_sem = ("parallel",)
    else:
        grid = (pl.cdiv(R, tile_r), pl.cdiv(W_out, tile_w))
        in_specs = [pl.BlockSpec((tile_r, tile_w), lambda r, w: (r, w))]
        out_specs = pl.BlockSpec((tile_r, tile_w), lambda r, w: (r, w))
        dim_sem = ("parallel", "parallel")

    out2 = pl.pallas_call(
        _chomp_copy_kernel,
        out_shape=jax.ShapeDtypeStruct((R, W_out), x.dtype),
        grid_spec=pltpu.PrefetchScalarGridSpec(
            num_scalar_prefetch=0,
            grid=grid,
            in_specs=in_specs,
            out_specs=out_specs,
        ),
        compiler_params=pltpu.CompilerParams(
            dimension_semantics=dim_sem,
            vmem_limit_bytes=int(vmem_limit),
        ),
    )(x2)

    return out2.reshape(N, C, H, W_out)


if __name__ == "__main__":
    key = jax.random.PRNGKey(0)

    # Small shapes consistent with the module (NCHW).
    N, C, H, W = 2, 4, 16, 16
    chomp_size = 4
    x = jax.random.normal(key, (N, C, H, W), dtype=jnp.float32)

    out = jax.block_until_ready(chomp2d(x, chomp_size))
    ref = x[:, :, :, :-chomp_size]
    assert out.shape == (N, C, H, W - chomp_size), out.shape
    assert out.dtype == x.dtype
    assert jnp.array_equal(out, ref), "mismatch vs reference slice (small-W path)"

    # Also exercise the lane-blocked (W_out >= 128) path at a modest size.
    x_big = jax.random.normal(jax.random.PRNGKey(1), (2, 2, 8, 384), dtype=jnp.float32)
    out_big = jax.block_until_ready(chomp2d(x_big, 7))
    ref_big = x_big[:, :, :, :-7]
    assert jnp.array_equal(out_big, ref_big), "mismatch vs reference slice (lane-blocked path)"

    print("KERNEL_OK")
</pallas_src>

<mosaic_0001>
module attributes {stable_mosaic.version = 11 : i64} {
  func.func @_chomp_copy_kernel(%arg0: i32, %arg1: memref<128x16xf32, #tpu.memory_space<vmem>>, %arg2: memref<128x12xf32, #tpu.memory_space<vmem>>) attributes {dimension_semantics = [#tpu.dimension_semantics<parallel>], iteration_bounds = array<i64: 1>, scalar_prefetch = 0 : i64, scratch_operands = 0 : i64, tpu.core_type = #tpu.core_type<tc>, window_params = [{transform_indices = @transform_0, window_bounds = array<i64: 128, 16>}, {transform_indices = @transform_1, window_bounds = array<i64: 128, 12>}]} {
    %c0 = arith.constant 0 : index
    %c0_0 = arith.constant 0 : index
    %0 = vector.load %arg1[%c0, %c0_0] : memref<128x16xf32, #tpu.memory_space<vmem>>, vector<128x12xf32>
    %c0_1 = arith.constant 0 : index
    %c0_2 = arith.constant 0 : index
    %1 = vector.load %arg2[%c0_1, %c0_2] : memref<128x12xf32, #tpu.memory_space<vmem>>, vector<128x12xf32>
    tpu.vector_store %arg2[%c0_1, %c0_2], %0 {strides = array<i32>} : memref<128x12xf32, #tpu.memory_space<vmem>>, vector<128x12xf32>,
    return
  }
  func.func @transform_0(%arg0: i32) -> (i32, i32) {
    %c0_i32 = arith.constant 0 : i32
    %c0_i32_0 = arith.constant 0 : i32
    return %arg0, %c0_i32 : i32, i32
  }
  func.func @transform_1(%arg0: i32) -> (i32, i32) {
    %c0_i32 = arith.constant 0 : i32
    %c0_i32_0 = arith.constant 0 : i32
    return %arg0, %c0_i32 : i32, i32
  }
}

</mosaic_0001>

<bundles_post_ra>
// kernel: tpu_custom_call.1
= control target key start
LH: loop header
LB: loop body
LE: loop exit
PB: predicated region body
PF: predicated region fallthrough
CT: control target
= control target key end

     0   :  { %vm24_vm0 = vcmask 97280   ;;  %s167_s0 = inlined_call_operand.vmem [shape: f32[128,16], index: 0, kind: input, shape index: {}]   ;;  %s168_s1 = inlined_call_operand.vmem [shape: f32[128,12], index: 1, kind: output, shape index: {}]  }
   0x1   :  { %v8_v0 = vld [vmem:[%s167_s0] sm:$0xff]  ;;  %v9_v1 = vld [vmem:[%s167_s0 + $0x8] sm:$0xff]  ;;  %v10_v2 = vld [vmem:[%s167_s0 + $0x10] sm:$0xff] }
   0x2   :  { %25 = vst.msk [vmem:[%s168_s1] sm:$0xff] %vm24_vm0, %v8_v0  ;;  %v11_v3 = vld [vmem:[%s167_s0 + $0x18] sm:$0xff]  ;;  %v12_v4 = vld [vmem:[%s167_s0 + $0x20] sm:$0xff]  ;;  %v13_v5 = vld [vmem:[%s167_s0 + $0x28] sm:$0xff] }
   0x3   :  { %26 = vst.msk [vmem:[%s168_s1 + $0x8] sm:$0xff] %vm24_vm0, %v9_v1  ;;  %v14_v6 = vld [vmem:[%s167_s0 + $0x30] sm:$0xff]  ;;  %v15_v7 = vld [vmem:[%s167_s0 + $0x38] sm:$0xff]  ;;  %v16_v8 = vld [vmem:[%s167_s0 + $0x40] sm:$0xff] }
   0x4   :  { %27 = vst.msk [vmem:[%s168_s1 + $0x10] sm:$0xff] %vm24_vm0, %v10_v2  ;;  %v17_v9 = vld [vmem:[%s167_s0 + $0x48] sm:$0xff]  ;;  %v18_v10 = vld [vmem:[%s167_s0 + $0x50] sm:$0xff]  ;;  %v19_v11 = vld [vmem:[%s167_s0 + $0x58] sm:$0xff] }
   0x5   :  { %28 = vst.msk [vmem:[%s168_s1 + $0x18] sm:$0xff] %vm24_vm0, %v11_v3  ;;  %v20_v12 = vld [vmem:[%s167_s0 + $0x60] sm:$0xff]  ;;  %v21_v13 = vld [vmem:[%s167_s0 + $0x68] sm:$0xff]  ;;  %v22_v14 = vld [vmem:[%s167_s0 + $0x70] sm:$0xff] }
   0x6   :  { %29 = vst.msk [vmem:[%s168_s1 + $0x20] sm:$0xff] %vm24_vm0, %v12_v4  ;;  %v23_v15 = vld [vmem:[%s167_s0 + $0x78] sm:$0xff] }
   0x7   :  { %30 = vst.msk [vmem:[%s168_s1 + $0x28] sm:$0xff] %vm24_vm0, %v13_v5 }
   0x8   :  { %31 = vst.msk [vmem:[%s168_s1 + $0x30] sm:$0xff] %vm24_vm0, %v14_v6 }
   0x9   :  { %32 = vst.msk [vmem:[%s168_s1 + $0x38] sm:$0xff] %vm24_vm0, %v15_v7 }
   0xa   :  { %33 = vst.msk [vmem:[%s168_s1 + $0x40] sm:$0xff] %vm24_vm0, %v16_v8 }
   0xb   :  { %34 = vst.msk [vmem:[%s168_s1 + $0x48] sm:$0xff] %vm24_vm0, %v17_v9 }
   0xc   :  { %35 = vst.msk [vmem:[%s168_s1 + $0x50] sm:$0xff] %vm24_vm0, %v18_v10 }
   0xd   :  { %36 = vst.msk [vmem:[%s168_s1 + $0x58] sm:$0xff] %vm24_vm0, %v19_v11 }
   0xe   :  { %37 = vst.msk [vmem:[%s168_s1 + $0x60] sm:$0xff] %vm24_vm0, %v20_v12 }
   0xf   :  { %38 = vst.msk [vmem:[%s168_s1 + $0x68] sm:$0xff] %vm24_vm0, %v21_v13 }
  0x10   :  { %39 = vst.msk [vmem:[%s168_s1 + $0x70] sm:$0xff] %vm24_vm0, %v22_v14 }
  0x11   :  { %40 = vst.msk [vmem:[%s168_s1 + $0x78] sm:$0xff] %vm24_vm0, %v23_v15 }

</bundles_post_ra>
